<compile_context>
chip_gen: v7x
topology: tpu7x:2x2x1
jax: 0.10.0
libtpu: 0.0.40
codegen_flags: <defaults>
</compile_context>

<pallas_src>
import functools

import jax
import jax.numpy as jnp
import numpy as np
from jax import lax
from jax.experimental import pallas as pl
from jax.experimental.pallas import tpu as pltpu

_LANES = 128


# ----------------------------------------------------------------------------
# Kernel
# ----------------------------------------------------------------------------
def _x_tpss_kernel(rs_ref, s2_ref, z_ref, y_ref, out_ref, *, mu, c, e, sqrt_e, rev):
    rs = rs_ref[...]
    s2 = s2_ref[...]
    z = z_ref[...]
    y = y_ref[...]

    b = 0.4
    kappa = 0.804

    a = 5.0 / 3 * y * (1.0 - z) - 1.0
    # rsqrt: single EUP op (argument positive on the physical domain y*(1-z) >= 0,
    # same assumption as the PyTorch reference).
    qb = 0.45 * a * lax.rsqrt(1.0 + b * a * (a + 1.0)) + 2.0 / 3 * s2

    z2 = z * z
    s4 = s2 * s2
    z_term = z2 * z if rev else z2
    one_p_z2 = 1.0 + z2

    # Factor qb out of both qb-dependent terms (one fewer VPU multiply chain).
    qb_terms = qb * (146.0 / 2025 * qb - 73.0 / 405 * z * jnp.sqrt(0.18 + 0.5 * y * y))

    x_num = (
        (10.0 / 81 + c * z_term / (one_p_z2 * one_p_z2)) * s2
        + qb_terms
        + 100.0 / (6561 * kappa) * s4
        + 4.0 * sqrt_e / 45 * z2
        + (e * mu) * s4 * s2
    )

    # Fold x_den, the F divide and the Slater 1/rs divide into ONE divide:
    #   x = x_num / d^2 ;  F = (kappa + x + kappa*x)/(kappa + x)
    #   F * (c_slater/rs) = c_slater*(kappa*d^2 + (1+kappa)*x_num)
    #                       / (rs*(kappa*d^2 + x_num))
    d = 1.0 + sqrt_e * s2
    t = kappa * (d * d) + x_num
    c_slater = -0.75 * (1.5 / np.pi) ** (2.0 / 3)
    out_ref[...] = c_slater * (t + kappa * x_num) / (rs * t)


# ----------------------------------------------------------------------------
# Chip-aware helpers
# ----------------------------------------------------------------------------
def _chip_info():
    """Return (vmem_capacity_bytes, multi_tensorcore, is_v5e) with safe fallbacks."""
    kind = ""
    try:
        kind = (getattr(jax.devices()[0], "device_kind", "") or "").lower()
    except Exception:
        pass
    multi_tc = "v7" in kind  # v7x: 2 TensorCores/chip share the grid via "parallel"
    is_v5e = ("v5e" in kind) or ("v5 lite" in kind) or ("v5lite" in kind)
    vmem_cap = (64 << 20) if multi_tc else (128 << 20)
    try:
        info = pltpu.get_tpu_info()
        vmem_cap = int(getattr(info, "vmem_capacity_bytes", vmem_cap))
    except Exception:
        pass
    return vmem_cap, multi_tc, is_v5e


def _pick_row_tile(rows: int, block_rows: int, multi_tc: bool) -> int:
    """Choose an 8-aligned row tile (biggest that fits), v7x-aware step count."""
    if rows <= 8:
        return rows  # single full-array block (allowed even if rows % 8 != 0)
    tile = max(8, (min(block_rows, rows) // 8) * 8)
    if multi_tc and rows >= 32:
        # Keep >= 4 grid steps so each of the 2 TensorCores gets >= 2 steps and
        # can still double-buffer its DMAs.
        quarter = (pl.cdiv(rows, 4) + 7) // 8 * 8
        tile = min(tile, max(8, quarter))
    return tile


# ----------------------------------------------------------------------------
# Pallas call on a lane-dense [rows, 128] slab
# ----------------------------------------------------------------------------
def _x_tpss_pallas_2d(rs2d, s22d, z2d, y2d, *, rev, block_rows, vmem_cap, multi_tc):
    rows, lanes = rs2d.shape
    dtype = rs2d.dtype

    mu = 0.14 if rev else 0.21951
    c = 2.35204 if rev else 1.59096
    e = 2.1677 if rev else 1.537
    sqrt_e = float(np.sqrt(2.1677)) if rev else float(np.sqrt(1.537))

    row_tile = _pick_row_tile(rows, block_rows, multi_tc)
    grid = (pl.cdiv(rows, row_tile),)
    spec = pl.BlockSpec((row_tile, lanes), lambda i: (i, 0))

    kernel = functools.partial(
        _x_tpss_kernel, mu=mu, c=c, e=e, sqrt_e=sqrt_e, rev=rev
    )

    # 5 streams (4 in + 1 out), double-buffered.
    vmem_bytes = 5 * 2 * row_tile * lanes * jnp.dtype(dtype).itemsize
    cp_kwargs = {"dimension_semantics": ("parallel",)}
    if vmem_bytes > (12 << 20):
        cap = int(vmem_cap * 3 // 4)  # never exceed ~75% of physical VMEM (v7x: 48 MiB)
        cp_kwargs["vmem_limit_bytes"] = max(12 << 20, min(int(vmem_bytes * 3 // 2), cap))

    return pl.pallas_call(
        kernel,
        out_shape=jax.ShapeDtypeStruct((rows, lanes), dtype),
        grid_spec=pltpu.PrefetchScalarGridSpec(
            num_scalar_prefetch=0,
            grid=grid,
            in_specs=[spec, spec, spec, spec],
            out_specs=spec,
        ),
        compiler_params=pltpu.CompilerParams(**cp_kwargs),
    )(rs2d, s22d, z2d, y2d)


# ----------------------------------------------------------------------------
# Pure-JAX formula (mirrors the PyTorch forward); also used for the <128-elem
# ragged tail so the ragged path never pads/copies the whole input in HBM.
# ----------------------------------------------------------------------------
def _x_tpss_jax(rs, s2, z, y, *, rev: bool):
    mu = 0.14 if rev else 0.21951
    c = 2.35204 if rev else 1.59096
    e = 2.1677 if rev else 1.537
    sqrt_e = np.sqrt(2.1677) if rev else np.sqrt(1.537)
    b = 0.4
    a = 5.0 / 3 * y * (1.0 - z) - 1.0
    qb_den = 1.0 / jnp.sqrt(1.0 + b * a * (a + 1))
    qb = 0.45 * a * qb_den + 2.0 / 3 * s2
    kappa = 0.804
    z2 = z**2
    s4 = s2**2
    x_num_1 = (10.0 / 81 + c * (z2 * z if rev else z2) / (1.0 + z2) ** 2) * s2
    x_num_3 = -73.0 / 405 * z * jnp.sqrt(0.18 + 0.5 * y**2) * qb
    x_num = (
        x_num_1
        + 146.0 / 2025 * qb**2
        + x_num_3
        + 100.0 / (6561 * kappa) * s4
        + 4.0 * sqrt_e / 45 * z2
        + e * mu * s4 * s2
    )
    x_den = 1.0 / (1.0 + sqrt_e * s2) ** 2
    x = x_num * x_den
    F = 1.0 + kappa - kappa**2 / (kappa + x)
    e_slater = -0.75 * (1.5 / np.pi) ** (2.0 / 3) / rs
    return F * e_slater


# ----------------------------------------------------------------------------
# Public wrapper
# ----------------------------------------------------------------------------
def x_tpss(rs, s2, z, y, *, rev: bool, block_rows: int | None = None):
    """Pallas TPSS / revTPSS exchange. All inputs share shape & dtype (float32)."""
    orig_shape = rs.shape
    dtype = rs.dtype
    n = int(np.prod(orig_shape)) if orig_shape else 1
    if n == 0:
        return jnp.zeros(orig_shape, dtype)

    vmem_cap, multi_tc, is_v5e = _chip_info()
    if block_rows is None:
        block_rows = 2048 if is_v5e else 4096  # 1 MiB / 2 MiB per stream per block

    rows_main = n // _LANES
    tail = n - rows_main * _LANES

    if tail == 0:
        # Fast path: reshape only (no pad / no slice -> no extra HBM traffic).
        rs2d, s22d, z2d, y2d = (
            jnp.reshape(a, (rows_main, _LANES)) for a in (rs, s2, z, y)
        )
        out2d = _x_tpss_pallas_2d(
            rs2d, s22d, z2d, y2d,
            rev=rev, block_rows=block_rows, vmem_cap=vmem_cap, multi_tc=multi_tc,
        )
        return out2d.reshape(orig_shape)

    # Ragged path: main part through the kernel, <=127-element tail in plain JAX.
    flat = [jnp.reshape(a, (-1,)) for a in (rs, s2, z, y)]
    main_n = rows_main * _LANES
    parts = []
    if rows_main > 0:
        slabs = [f[:main_n].reshape(rows_main, _LANES) for f in flat]
        out_main = _x_tpss_pallas_2d(
            *slabs, rev=rev, block_rows=block_rows, vmem_cap=vmem_cap,
            multi_tc=multi_tc,
        )
        parts.append(out_main.reshape(-1))
    tail_in = [f[main_n:] for f in flat]
    parts.append(_x_tpss_jax(*tail_in, rev=rev).astype(dtype))
    out = jnp.concatenate(parts) if len(parts) > 1 else parts[0]
    return out.reshape(orig_shape)


# ----------------------------------------------------------------------------
# Self-test
# ----------------------------------------------------------------------------
if __name__ == "__main__":
    key = jax.random.PRNGKey(0)
    k1, k2, k3, k4 = jax.random.split(key, 4)
    shape = (2, 4, 16, 16)  # e.g. (n_spin_like, channels, spatial, spatial)

    # Physically-plausible positive ranges.
    rs = jax.random.uniform(k1, shape, jnp.float32, minval=0.5, maxval=5.0)
    s2 = jax.random.uniform(k2, shape, jnp.float32, minval=0.0, maxval=4.0)
    z = jax.random.uniform(k3, shape, jnp.float32, minval=0.0, maxval=1.0)
    y = jax.random.uniform(k4, shape, jnp.float32, minval=0.0, maxval=2.0)

    ok = True
    for rev in (False, True):
        out = jax.block_until_ready(x_tpss(rs, s2, z, y, rev=rev))
        ref = _x_tpss_jax(rs, s2, z, y, rev=rev)
        if not np.allclose(np.asarray(out), np.asarray(ref), rtol=1e-5, atol=1e-6):
            ok = False

    # Also exercise a ragged size (hits the main + plain-JAX tail path).
    n_ragged = 1000
    rs_r = jax.random.uniform(k1, (n_ragged,), jnp.float32, minval=0.5, maxval=5.0)
    s2_r = jax.random.uniform(k2, (n_ragged,), jnp.float32, minval=0.0, maxval=4.0)
    z_r = jax.random.uniform(k3, (n_ragged,), jnp.float32, minval=0.0, maxval=1.0)
    y_r = jax.random.uniform(k4, (n_ragged,), jnp.float32, minval=0.0, maxval=2.0)
    out_r = jax.block_until_ready(x_tpss(rs_r, s2_r, z_r, y_r, rev=True))
    ref_r = _x_tpss_jax(rs_r, s2_r, z_r, y_r, rev=True)
    if not np.allclose(np.asarray(out_r), np.asarray(ref_r), rtol=1e-5, atol=1e-6):
        ok = False

    if ok:
        print("KERNEL_OK")
</pallas_src>

<mosaic_0001>
module attributes {stable_mosaic.version = 11 : i64} {
  func.func @_x_tpss_kernel(%arg0: i32, %arg1: memref<16x128xf32, #tpu.memory_space<vmem>>, %arg2: memref<16x128xf32, #tpu.memory_space<vmem>>, %arg3: memref<16x128xf32, #tpu.memory_space<vmem>>, %arg4: memref<16x128xf32, #tpu.memory_space<vmem>>, %arg5: memref<16x128xf32, #tpu.memory_space<vmem>>) attributes {dimension_semantics = [#tpu.dimension_semantics<parallel>], iteration_bounds = array<i64: 1>, scalar_prefetch = 0 : i64, scratch_operands = 0 : i64, tpu.core_type = #tpu.core_type<tc>, window_params = [{transform_indices = @transform_0, window_bounds = array<i64: 16, 128>}, {transform_indices = @transform_1, window_bounds = array<i64: 16, 128>}, {transform_indices = @transform_2, window_bounds = array<i64: 16, 128>}, {transform_indices = @transform_3, window_bounds = array<i64: 16, 128>}, {transform_indices = @transform_4, window_bounds = array<i64: 16, 128>}]} {
    %c0 = arith.constant 0 : index
    %c0_0 = arith.constant 0 : index
    %0 = vector.load %arg1[%c0, %c0_0] : memref<16x128xf32, #tpu.memory_space<vmem>>, vector<16x128xf32>
    %c0_1 = arith.constant 0 : index
    %c0_2 = arith.constant 0 : index
    %1 = vector.load %arg2[%c0_1, %c0_2] : memref<16x128xf32, #tpu.memory_space<vmem>>, vector<16x128xf32>
    %c0_3 = arith.constant 0 : index
    %c0_4 = arith.constant 0 : index
    %2 = vector.load %arg3[%c0_3, %c0_4] : memref<16x128xf32, #tpu.memory_space<vmem>>, vector<16x128xf32>
    %c0_5 = arith.constant 0 : index
    %c0_6 = arith.constant 0 : index
    %3 = vector.load %arg4[%c0_5, %c0_6] : memref<16x128xf32, #tpu.memory_space<vmem>>, vector<16x128xf32>
    %cst = arith.constant 1.66666663 : f32
    %4 = vector.broadcast %cst : f32 to vector<16x128xf32>
    %5 = arith.mulf %4, %3 : vector<16x128xf32>
    %cst_7 = arith.constant 1.000000e+00 : f32
    %6 = vector.broadcast %cst_7 : f32 to vector<16x128xf32>
    %7 = arith.subf %6, %2 : vector<16x128xf32>
    %8 = arith.mulf %5, %7 : vector<16x128xf32>
    %cst_8 = arith.constant 1.000000e+00 : f32
    %9 = vector.broadcast %cst_8 : f32 to vector<16x128xf32>
    %10 = arith.subf %8, %9 : vector<16x128xf32>
    %cst_9 = arith.constant 4.500000e-01 : f32
    %11 = vector.broadcast %cst_9 : f32 to vector<16x128xf32>
    %12 = arith.mulf %11, %10 : vector<16x128xf32>
    %cst_10 = arith.constant 4.000000e-01 : f32
    %13 = vector.broadcast %cst_10 : f32 to vector<16x128xf32>
    %14 = arith.mulf %13, %10 : vector<16x128xf32>
    %cst_11 = arith.constant 1.000000e+00 : f32
    %15 = vector.broadcast %cst_11 : f32 to vector<16x128xf32>
    %16 = arith.addf %10, %15 : vector<16x128xf32>
    %17 = arith.mulf %14, %16 : vector<16x128xf32>
    %cst_12 = arith.constant 1.000000e+00 : f32
    %18 = vector.broadcast %cst_12 : f32 to vector<16x128xf32>
    %19 = arith.addf %18, %17 : vector<16x128xf32>
    %20 = math.rsqrt %19 : vector<16x128xf32>
    %21 = arith.mulf %12, %20 : vector<16x128xf32>
    %cst_13 = arith.constant 0.666666686 : f32
    %22 = vector.broadcast %cst_13 : f32 to vector<16x128xf32>
    %23 = arith.mulf %22, %1 : vector<16x128xf32>
    %24 = arith.addf %21, %23 : vector<16x128xf32>
    %25 = arith.mulf %2, %2 : vector<16x128xf32>
    %26 = arith.mulf %1, %1 : vector<16x128xf32>
    %cst_14 = arith.constant 1.000000e+00 : f32
    %27 = vector.broadcast %cst_14 : f32 to vector<16x128xf32>
    %28 = arith.addf %27, %25 : vector<16x128xf32>
    %cst_15 = arith.constant 0.0720987617 : f32
    %29 = vector.broadcast %cst_15 : f32 to vector<16x128xf32>
    %30 = arith.mulf %29, %24 : vector<16x128xf32>
    %cst_16 = arith.constant 0.180246919 : f32
    %31 = vector.broadcast %cst_16 : f32 to vector<16x128xf32>
    %32 = arith.mulf %31, %2 : vector<16x128xf32>
    %cst_17 = arith.constant 5.000000e-01 : f32
    %33 = vector.broadcast %cst_17 : f32 to vector<16x128xf32>
    %34 = arith.mulf %33, %3 : vector<16x128xf32>
    %35 = arith.mulf %34, %3 : vector<16x128xf32>
    %cst_18 = arith.constant 1.800000e-01 : f32
    %36 = vector.broadcast %cst_18 : f32 to vector<16x128xf32>
    %37 = arith.addf %36, %35 : vector<16x128xf32>
    %38 = math.sqrt %37 : vector<16x128xf32>
    %39 = arith.mulf %32, %38 : vector<16x128xf32>
    %40 = arith.subf %30, %39 : vector<16x128xf32>
    %41 = arith.mulf %24, %40 : vector<16x128xf32>
    %cst_19 = arith.constant 1.590960e+00 : f32
    %42 = vector.broadcast %cst_19 : f32 to vector<16x128xf32>
    %43 = arith.mulf %42, %25 : vector<16x128xf32>
    %44 = arith.mulf %28, %28 : vector<16x128xf32>
    %45 = arith.divf %43, %44 : vector<16x128xf32>
    %cst_20 = arith.constant 0.123456791 : f32
    %46 = vector.broadcast %cst_20 : f32 to vector<16x128xf32>
    %47 = arith.addf %46, %45 : vector<16x128xf32>
    %48 = arith.mulf %47, %1 : vector<16x128xf32>
    %49 = arith.addf %48, %41 : vector<16x128xf32>
    %cst_21 = arith.constant 0.0189571884 : f32
    %50 = vector.broadcast %cst_21 : f32 to vector<16x128xf32>
    %51 = arith.mulf %50, %26 : vector<16x128xf32>
    %52 = arith.addf %49, %51 : vector<16x128xf32>
    %cst_22 = arith.constant 0.110200718 : f32
    %53 = vector.broadcast %cst_22 : f32 to vector<16x128xf32>
    %54 = arith.mulf %53, %25 : vector<16x128xf32>
    %55 = arith.addf %52, %54 : vector<16x128xf32>
    %cst_23 = arith.constant 0.337386876 : f32
    %56 = vector.broadcast %cst_23 : f32 to vector<16x128xf32>
    %57 = arith.mulf %56, %26 : vector<16x128xf32>
    %58 = arith.mulf %57, %1 : vector<16x128xf32>
    %59 = arith.addf %55, %58 : vector<16x128xf32>
    %cst_24 = arith.constant 1.23975801 : f32
    %60 = vector.broadcast %cst_24 : f32 to vector<16x128xf32>
    %61 = arith.mulf %60, %1 : vector<16x128xf32>
    %cst_25 = arith.constant 1.000000e+00 : f32
    %62 = vector.broadcast %cst_25 : f32 to vector<16x128xf32>
    %63 = arith.addf %62, %61 : vector<16x128xf32>
    %64 = arith.mulf %63, %63 : vector<16x128xf32>
    %cst_26 = arith.constant 8.040000e-01 : f32
    %65 = vector.broadcast %cst_26 : f32 to vector<16x128xf32>
    %66 = arith.mulf %65, %64 : vector<16x128xf32>
    %67 = arith.addf %66, %59 : vector<16x128xf32>
    %cst_27 = arith.constant 8.040000e-01 : f32
    %68 = vector.broadcast %cst_27 : f32 to vector<16x128xf32>
    %69 = arith.mulf %68, %59 : vector<16x128xf32>
    %70 = arith.addf %67, %69 : vector<16x128xf32>
    %cst_28 = arith.constant -0.458165288 : f32
    %71 = vector.broadcast %cst_28 : f32 to vector<16x128xf32>
    %72 = arith.mulf %71, %70 : vector<16x128xf32>
    %73 = arith.mulf %0, %67 : vector<16x128xf32>
    %74 = arith.divf %72, %73 : vector<16x128xf32>
    %c0_29 = arith.constant 0 : index
    %c0_30 = arith.constant 0 : index
    %75 = vector.load %arg5[%c0_29, %c0_30] : memref<16x128xf32, #tpu.memory_space<vmem>>, vector<16x128xf32>
    tpu.vector_store %arg5[%c0_29, %c0_30], %74 {strides = array<i32>} : memref<16x128xf32, #tpu.memory_space<vmem>>, vector<16x128xf32>,
    return
  }
  func.func @transform_0(%arg0: i32) -> (i32, i32) {
    %c0_i32 = arith.constant 0 : i32
    %c0_i32_0 = arith.constant 0 : i32
    return %arg0, %c0_i32 : i32, i32
  }
  func.func @transform_1(%arg0: i32) -> (i32, i32) {
    %c0_i32 = arith.constant 0 : i32
    %c0_i32_0 = arith.constant 0 : i32
    return %arg0, %c0_i32 : i32, i32
  }
  func.func @transform_2(%arg0: i32) -> (i32, i32) {
    %c0_i32 = arith.constant 0 : i32
    %c0_i32_0 = arith.constant 0 : i32
    return %arg0, %c0_i32 : i32, i32
  }
  func.func @transform_3(%arg0: i32) -> (i32, i32) {
    %c0_i32 = arith.constant 0 : i32
    %c0_i32_0 = arith.constant 0 : i32
    return %arg0, %c0_i32 : i32, i32
  }
  func.func @transform_4(%arg0: i32) -> (i32, i32) {
    %c0_i32 = arith.constant 0 : i32
    %c0_i32_0 = arith.constant 0 : i32
    return %arg0, %c0_i32 : i32, i32
  }
}

</mosaic_0001>

<bundles_post_ra>
// kernel: tpu_custom_call.1
= control target key start
LH: loop header
LB: loop body
LE: loop exit
PB: predicated region body
PF: predicated region fallthrough
CT: control target
= control target key end

     0   :  { %9 = vsyncpa [#allocation3], 0  ;;  %s488_s0 = inlined_call_operand.hbm [shape: f32[16,128], index: 0, kind: input, shape index: {}]   ;;  %s489_s1 = inlined_call_operand.hbm [shape: f32[16,128], index: 1, kind: input, shape index: {}]   ;;  %s490_s2 = inlined_call_operand.hbm [shape: f32[16,128], index: 2, kind: input, shape index: {}]   ;;  %s491_s3 = inlined_call_operand.hbm [shape: f32[16,128], index: 3, kind: input, shape index: {}]   ;;  %s492_s4 = inlined_call_operand.hbm [shape: f32[16,128], index: 4, kind: output, shape index: {}]  }
   0x1   :  { %10 = vsyncpa [#allocation6], 0 }
   0x2   :  { %11 = vsyncpa [#allocation9], 0 }
   0x3   :  { %12 = vsyncpa [#allocation4], 0  ;;  %s357_s15 = smov [#allocation5]   ;;  %s358_s17 = smov [#allocation2]  }
   0x4   :  { %s30_s16 = sshll.u32 %s357_s15, 4  ;;  %s18_s18 = sshll.u32 %s358_s17, 4  ;;  %s31_s16 = int_to_ptr.vmem [resolvable:$true] %s30_s16  ;;  %s389_s18 = int_to_ptr.vmem [resolvable:$true] %s18_s18 }
   0x5   :  { %s239_s21 = scalar_lea.hbm %s489_s1, 256 }
   0x6   :  { %p240_p0 = scmp.ne.s32.totalorder %s489_s1, %s239_s21  ;;  %p243_p1 = scmp.lt.u32.totalorder %s239_s21, %s489_s1 }
   0x8   :  { %p245_p2 = pnand %p243_p1, %p240_p0 }
   0xa   :  { %248 = shalt.err (!%p245_p2)
}
   0xb   :  { %s249_s26 = scalar_lea.vmem %s31_s16, 256  ;;  %p254_p4 = scmp.lt.s32.totalorder %s31_s16, %s31_s16 }
   0xc   :  { %p250_p3 = scmp.ne.s32.totalorder %s31_s16, %s249_s26  ;;  %p255_p5 = scmp.lt.s32.totalorder %s249_s26, %s249_s26 }
   0xe   :  { %p256_p6 = por %p255_p5, %p254_p4 }
  0x10   :  { %p257_p7 = pnand %p256_p6, %p250_p3 }
  0x12   :  { %260 = shalt.err (!%p257_p7)
}
  0x13   :  { %s359_s27 = smov 128   ;;  %s360_s28 = smov 8  }
  0x14   :  { %36 = dma.hbm_to_vmem [thread:$0]  %s489_s1, 256, %s31_s16, [#allocation6], %s359_s27, %s359_s27, %s360_s28  }
  0x15   :  { %s261_s7 = scalar_lea.hbm %s488_s0, 256 }
  0x16   :  { %p262_p8 = scmp.ne.s32.totalorder %s488_s0, %s261_s7  ;;  %p265_p9 = scmp.lt.u32.totalorder %s261_s7, %s488_s0 }
  0x18   :  { %p267_p10 = pnand %p265_p9, %p262_p8 }
  0x1a   :  { %270 = shalt.err (!%p267_p10)
}
  0x1b   :  { %s271_s12 = scalar_lea.vmem %s389_s18, 256  ;;  %p276_p12 = scmp.lt.s32.totalorder %s389_s18, %s389_s18 }
  0x1c   :  { %p272_p11 = scmp.ne.s32.totalorder %s389_s18, %s271_s12  ;;  %p277_p13 = scmp.lt.s32.totalorder %s271_s12, %s271_s12 }
  0x1e   :  { %p278_p0 = por %p277_p13, %p276_p12 }
  0x20   :  { %p279_p1 = pnand %p278_p0, %p272_p11 }
  0x22   :  { %282 = shalt.err (!%p279_p1)
}
  0x23   :  { %24 = dma.hbm_to_vmem [thread:$0]  %s488_s0, 256, %s389_s18, [#allocation3], %s359_s27, %s359_s27, %s360_s28  }
  0x24   :  { %s361_s14 = smov [#allocation7]   ;;  %s362_s16 = smov [#allocation8]  }
  0x25   :  { %s42_s15 = sshll.u32 %s361_s14, 4  ;;  %s54_s17 = sshll.u32 %s362_s16, 4  ;;  %s43_s15 = int_to_ptr.vmem [resolvable:$true] %s42_s15  ;;  %s426_s17 = int_to_ptr.vmem [resolvable:$true] %s54_s17 }
  0x26   :  { %s283_s21 = scalar_lea.hbm %s490_s2, 256 }
  0x27   :  { %p284_p2 = scmp.ne.s32.totalorder %s490_s2, %s283_s21  ;;  %p287_p3 = scmp.lt.u32.totalorder %s283_s21, %s490_s2 }
  0x29   :  { %p289_p4 = pnand %p287_p3, %p284_p2 }
  0x2b   :  { %292 = shalt.err (!%p289_p4)
}
  0x2c   :  { %s293_s0 = scalar_lea.vmem %s43_s15, 256  ;;  %p298_p6 = scmp.lt.s32.totalorder %s43_s15, %s43_s15 }
  0x2d   :  { %p294_p5 = scmp.ne.s32.totalorder %s43_s15, %s293_s0  ;;  %p299_p7 = scmp.lt.s32.totalorder %s293_s0, %s293_s0 }
  0x2f   :  { %p300_p8 = por %p299_p7, %p298_p6 }
  0x31   :  { %p301_p9 = pnand %p300_p8, %p294_p5 }
  0x33   :  { %304 = shalt.err (!%p301_p9)
}
  0x34   :  { %48 = dma.hbm_to_vmem [thread:$0]  %s490_s2, 256, %s43_s15, [#allocation6], %s359_s27, %s359_s27, %s360_s28  }
  0x35   :  { %s305_s5 = scalar_lea.hbm %s491_s3, 256 }
  0x36   :  { %p306_p10 = scmp.ne.s32.totalorder %s491_s3, %s305_s5  ;;  %p309_p11 = scmp.lt.u32.totalorder %s305_s5, %s491_s3 }
  0x38   :  { %p311_p12 = pnand %p309_p11, %p306_p10 }
  0x3a   :  { %314 = shalt.err (!%p311_p12)
}
  0x3b   :  { %s315_s10 = scalar_lea.vmem %s426_s17, 256  ;;  %p320_p0 = scmp.lt.s32.totalorder %s426_s17, %s426_s17 }
  0x3c   :  { %p316_p13 = scmp.ne.s32.totalorder %s426_s17, %s315_s10  ;;  %p321_p1 = scmp.lt.s32.totalorder %s315_s10, %s315_s10 }
  0x3e   :  { %p322_p2 = por %p321_p1, %p320_p0 }
  0x40   :  { %p323_p3 = pnand %p322_p2, %p316_p13 }
  0x42   :  { %326 = shalt.err (!%p323_p3)
}
  0x43   :  { %60 = dma.hbm_to_vmem [thread:$0]  %s491_s3, 256, %s426_s17, [#allocation9], %s359_s27, %s359_s27, %s360_s28  }
  0x44   :  { %349 = dma.done.wait [#allocation3], 256  }
  0x45   :  { %350 = vsyncadd [#allocation3], 4294967040 }
  0x46   :  { %351 = dma.done.wait [#allocation6], 512  }
  0x47   :  { %352 = vsyncadd [#allocation6], 4294966784 }
  0x48   :  { %353 = dma.done.wait [#allocation9], 256  }
  0x49   :  { %354 = vsyncadd [#allocation9], 4294967040  ;;  %v77_v0 = vld [vmem:[#allocation7] sm:$0xff]  ;;  %v79_v1 = vld [vmem:[#allocation8] sm:$0xff]  ;;  %s363_s3 = smov [#allocation10]  }
  0x4a   :  { %v83_v2 = vsub.f32 1.0, %v77_v0  ;;  %v463_v3 = vmul.f32 %v77_v0, %v77_v0  ;;  %v81_v4 = vmul.f32 1.6666666, %v79_v1  ;;  %v117_v5 = vmul.f32 0.5, %v79_v1  ;;  %v78_v6 = vld [vmem:[#allocation7 + $0x8] sm:$0xff]  ;;  %v80_v8 = vld [vmem:[#allocation8 + $0x8] sm:$0xff] }
  0x4b   :  { %v466_v9 = vmul.f32 %v78_v6, %v78_v6  ;;  %v82_v13 = vmul.f32 1.6666666, %v80_v8  ;;  %v84_v14 = vsub.f32 1.0, %v78_v6  ;;  %v118_v23 = vmul.f32 0.5, %v80_v8  ;;  %v75_v35 = vld [vmem:[#allocation5] sm:$0xff]  ;;  %v76_v44 = vld [vmem:[#allocation5 + $0x8] sm:$0xff] }
  0x4c   :  { %v111_v7 = vadd.f32 1.0, %v463_v3  ;;  %v85_v10 = vmul.f32 %v83_v2, %v81_v4  ;;  %v119_v11 = vmul.f32 %v117_v5, %v79_v1  ;;  %v143_v33 = vmul.f32 1.59096, %v463_v3  ;;  %s200_s12 = sshll.u32 %s363_s3, 4  ;;  %s201_s12 = int_to_ptr.vmem [resolvable:$true] %s200_s12 }
  0x4d   :  { %v86_v17 = vmul.f32 %v84_v14, %v82_v13  ;;  %v112_v18 = vadd.f32 1.0, %v466_v9  ;;  %v120_v28 = vmul.f32 %v118_v23, %v80_v8  ;;  %v103_v40 = vmul.f32 0.6666667, %v75_v35  ;;  %s327_s1 = scalar_lea.vmem %s201_s12, 256  ;;  %p332_p5 = scmp.lt.s32.totalorder %s201_s12, %s201_s12 }
  0x4e   :  { %v145_v12 = vmul.f32 %v111_v7, %v111_v7  ;;  %v214_v15 = vadd.f32 -1.0, %v85_v10  ;;  %v121_v16 = vadd.f32 0.18, %v119_v11  ;;  %v115_v43 = vmul.f32 0.18024692, %v77_v0  ;;  %p328_p4 = scmp.ne.s32.totalorder %s201_s12, %s327_s1  ;;  %p333_p6 = scmp.lt.s32.totalorder %s327_s1, %s327_s1 }
  0x4f   :  { %v215_v22 = vadd.f32 -1.0, %v86_v17  ;;  %v146_v24 = vmul.f32 %v112_v18, %v112_v18  ;;  %v122_v30 = vadd.f32 0.18, %v120_v28  ;;  %v144_v45 = vmul.f32 1.59096, %v466_v9 }
  0x50   :  { %v91_v19 = vmul.f32 0.4, %v214_v15  ;;  %v93_v20 = vadd.f32 1.0, %v214_v15  ;;  %223 = vrsqrt.f32 %v121_v16  ;;  %vm125_vm0 = vcmp.eq.f32.partialorder %v121_v16, inf  ;;  %p334_p7 = por %p333_p6, %p332_p5 }
  0x51   :  { %225 = vrcp.f32 %v145_v12  ;;  %v92_v26 = vmul.f32 0.4, %v215_v22  ;;  %v94_v27 = vadd.f32 1.0, %v215_v22  ;;  %v128_v37 = vand.u32 2147483648, %v121_v16 }
  0x52   :  { %v95_v21 = vmul.f32 %v93_v20, %v91_v19  ;;  %227 = vrcp.f32 %v146_v24  ;;  %v89_v38 = vmul.f32 0.45, %v214_v15  ;;  %vm127_vm1 = vcmp.eq.f32.partialorder %v121_v16, 0.0  ;;  %p335_p8 = pnand %p334_p7, %p328_p4 }
  0x53   :  { %v96_v29 = vmul.f32 %v94_v27, %v92_v26  ;;  %v171_v49 = vmul.f32 1.239758, %v75_v35  ;;  %v90_v50 = vmul.f32 0.45, %v215_v22  ;;  %v104_v52 = vmul.f32 0.6666667, %v76_v44 }
  0x54   :  { %v97_v25 = vadd.f32 1.0, %v95_v21  ;;  %vm132_vm2 = vcmp.eq.f32.partialorder %v122_v30, inf  ;;  %v135_v56 = vand.u32 2147483648, %v122_v30  ;;  %v116_v59 = vmul.f32 0.18024692, %v78_v6 }
  0x55   :  { %v98_v31 = vadd.f32 1.0, %v96_v29  ;;  %vm134_vm3 = vcmp.eq.f32.partialorder %v122_v30, 0.0  ;;  %v109_v61 = vmul.f32 %v75_v35, %v75_v35  ;;  %v173_v1 = vadd.f32 1.0, %v171_v49 }
  0x56   :  { %229 = vrsqrt.f32 %v97_v25  ;;  %v172_v4 = vmul.f32 1.239758, %v76_v44  ;;  %v110_v15 = vmul.f32 %v76_v44, %v76_v44  ;;  %v161_v6 = vmul.f32 0.11020072, %v463_v3  ;;  %v73_v3 = vld [vmem:[#allocation2] sm:$0xff] }
  0x57   :  { %231 = vrsqrt.f32 %v122_v30  ;;  %v165_v11 = vmul.f32 0.33738688, %v109_v61  ;;  %v157_v14 = vmul.f32 0.018957188, %v109_v61  ;;  %v175_v17 = vmul.f32 %v173_v1, %v173_v1 }
  0x58   :  { %233 = vrsqrt.f32 %v98_v31  ;;  %v174_v21 = vadd.f32 1.0, %v172_v4  ;;  %v158_v25 = vmul.f32 0.018957188, %v110_v15  ;;  %v166_v26 = vmul.f32 0.33738688, %v110_v15 }
  0x59   :  { %v167_v22 = vmul.f32 %v165_v11, %v75_v35  ;;  %v177_v27 = vmul.f32 0.804, %v175_v17 }
  0x5a   :  { %v224_v32 = vpop.eup %223  ;;  %v176_v31 = vmul.f32 %v174_v21, %v174_v21 }
  0x5b   :  { %v226_v34 = vpop.eup %225  ;;  %v124_v36 = vmul.f32 %v224_v32, %v121_v16 }
  0x5c   :  { %v148_v41 = vmul.f32 %v226_v34, %v143_v33  ;;  %v228_v42 = vpop.eup %227  ;;  %v168_v34 = vmul.f32 %v166_v26, %v76_v44 }
  0x5d   :  { %v126_v39 = vsel %vm125_vm0, %v121_v16, %v124_v36  ;;  %v150_v57 = vmul.f32 %v228_v42, %v144_v45 }
  0x5e   :  { %v129_v47 = vsel %vm127_vm1, %v128_v37, %v126_v39  ;;  %v151_v51 = vadd.f32 0.12345679, %v148_v41  ;;  %v74_v41 = vld [vmem:[#allocation2 + $0x8] sm:$0xff] }
  0x5f   :  { %v137_v55 = vmul.f32 %v129_v47, %v115_v43  ;;  %v152_v10 = vadd.f32 0.12345679, %v150_v57 }
  0x60   :  { %v230_v46 = vpop.eup %229  ;;  %v153_v0 = vmul.f32 %v151_v51, %v75_v35 }
  0x61   :  { %v101_v48 = vmul.f32 %v230_v46, %v89_v38  ;;  %v232_v53 = vpop.eup %231  ;;  %v154_v20 = vmul.f32 %v152_v10, %v76_v44  ;;  %v178_v38 = vmul.f32 0.804, %v176_v31 }
  0x62   :  { %v234_v58 = vpop.eup %233  ;;  %v131_v60 = vmul.f32 %v232_v53, %v122_v30 }
  0x63   :  { %v105_v54 = vadd.f32 %v103_v40, %v101_v48  ;;  %v102_v63 = vmul.f32 %v234_v58, %v90_v50 }
  0x64   :  { %v133_v2 = vsel %vm132_vm2, %v122_v30, %v131_v60  ;;  %v162_v30 = vmul.f32 0.11020072, %v466_v9 }
  0x65   :  { %v113_v62 = vmul.f32 0.07209876, %v105_v54  ;;  %v106_v7 = vadd.f32 %v104_v52, %v102_v63  ;;  %v136_v8 = vsel %vm134_vm3, %v135_v56, %v133_v2 }
  0x66   :  { %v138_v12 = vmul.f32 %v136_v8, %v116_v59 }
  0x67   :  { %v139_v5 = vsub.f32 %v113_v62, %v137_v55  ;;  %v114_v16 = vmul.f32 0.07209876, %v106_v7 }
  0x69   :  { %v141_v13 = vmul.f32 %v139_v5, %v105_v54  ;;  %v140_v19 = vsub.f32 %v114_v16, %v138_v12 }
  0x6b   :  { %v155_v18 = vadd.f32 %v153_v0, %v141_v13  ;;  %v142_v24 = vmul.f32 %v140_v19, %v106_v7 }
  0x6d   :  { %v159_v23 = vadd.f32 %v157_v14, %v155_v18  ;;  %v156_v29 = vadd.f32 %v154_v20, %v142_v24 }
  0x6f   :  { %v163_v28 = vadd.f32 %v161_v6, %v159_v23  ;;  %v160_v33 = vadd.f32 %v158_v25, %v156_v29 }
  0x71   :  { %v169_v32 = vadd.f32 %v167_v22, %v163_v28  ;;  %v164_v37 = vadd.f32 %v162_v30, %v160_v33 }
  0x73   :  { %v179_v36 = vadd.f32 %v177_v27, %v169_v32  ;;  %v170_v40 = vadd.f32 %v168_v34, %v164_v37  ;;  %v181_v35 = vmul.f32 0.804, %v169_v32 }
  0x75   :  { %v187_v39 = vmul.f32 %v179_v36, %v73_v3  ;;  %v180_v42 = vadd.f32 %v178_v38, %v170_v40  ;;  %v183_v45 = vadd.f32 %v181_v35, %v179_v36  ;;  %v182_v46 = vmul.f32 0.804, %v170_v40 }
  0x77   :  { %235 = vrcp.f32 %v187_v39  ;;  %v188_v43 = vmul.f32 %v180_v42, %v74_v41  ;;  %v185_v47 = vmul.f32 -0.4581653, %v183_v45  ;;  %v184_v9 = vadd.f32 %v182_v46, %v180_v42 }
  0x79   :  { %237 = vrcp.f32 %v188_v43  ;;  %v186_v50 = vmul.f32 -0.4581653, %v184_v9 }
  0x81   :  { %v236_v48 = vpop.eup %235 }
  0x82   :  { %v190_v49 = vmul.f32 %v236_v48, %v185_v47 }
  0x83   :  { %v238_v44 = vpop.eup %237 }
  0x84   :  { %193 = vst [vmem:[#allocation10] sm:$0xff] %v190_v49  ;;  %v192_v51 = vmul.f32 %v238_v44, %v186_v50 }
  0x86   :  { %194 = vst [vmem:[#allocation10 + $0x8] sm:$0xff] %v192_v51 }
  0x87   :  { %338 = shalt.err (!%p335_p8)
}
  0x88   :  { %s339_s15 = scalar_lea.hbm %s492_s4, 256 }
  0x89   :  { %p340_p9 = scmp.ne.s32.totalorder %s492_s4, %s339_s15  ;;  %p343_p10 = scmp.lt.u32.totalorder %s339_s15, %s492_s4 }
  0x8b   :  { %p345_p11 = pnand %p343_p10, %p340_p9 }
  0x8d   :  { %348 = shalt.err (!%p345_p11)
}
  0x8e   :  { %206 = dma.vmem_to_hbm [thread:$0]  %s201_s12, 256, %s492_s4, [#allocation4], %s359_s27, %s359_s27, %s360_s28  }
  0x8f   :  { %355 = dma.done.wait [#allocation4], 256  }
  0x90   :  { %356 = vsyncadd [#allocation4], 4294967040 }
  0x91   :  { %210 = vsyncpa [#allocation3], 1 }
  0x92   :  { %211 = vsyncpa [#allocation6], 1 }
  0x93   :  { %212 = vsyncpa [#allocation9], 1 }
  0x94   :  { %213 = vsyncpa [#allocation4], 1 }

</bundles_post_ra>
